<compile_context>
chip_gen: v6e
topology: v6e:2x2x1
jax: 0.10.0
libtpu: 0.0.40
codegen_flags: <defaults>
</compile_context>

<pallas_src>
import numpy as np
import jax
import jax.numpy as jnp
from jax.experimental import pallas as pl
from jax.experimental.pallas import tpu as pltpu


def _round_up(v: int, m: int) -> int:
    return ((v + m - 1) // m) * m


# ----------------------------- trace-time constants -----------------------------

def _pos_rows(h: int, w: int, hwp: int) -> jnp.ndarray:
    """(8, hwp) f32 rows [px, py, px^2, py^2, 0, 0, 0, 0] (row-major flattened H*W)."""
    hw = h * w
    px = np.tile(np.linspace(-1.0, 1.0, w, dtype=np.float32), h)
    py = np.repeat(np.linspace(-1.0, 1.0, h, dtype=np.float32), w)
    rows = np.zeros((8, hwp), dtype=np.float32)
    rows[0, :hw] = px
    rows[1, :hw] = py
    rows[2, :hw] = px * px
    rows[3, :hw] = py * py
    return jnp.asarray(rows)


def _pos_matrix(h: int, w: int, hwp: int) -> jnp.ndarray:
    """(hwp, 128) f32 columns [1, px, py, px^2, py^2, 0...] for the MXU moment matmul."""
    hw = h * w
    px = np.tile(np.linspace(-1.0, 1.0, w, dtype=np.float32), h)
    py = np.repeat(np.linspace(-1.0, 1.0, h, dtype=np.float32), w)
    pmat = np.zeros((hwp, 128), dtype=np.float32)
    pmat[:hw, 0] = 1.0
    pmat[:hw, 1] = px
    pmat[:hw, 2] = py
    pmat[:hw, 3] = px * px
    pmat[:hw, 4] = py * py
    return jnp.asarray(pmat)


# ----------------------------- Pallas kernels (hot path: one pass over x) -----------------------------

def _moments_mxu_kernel(x_ref, p_ref, out_ref):
    """out[:, :5] = [S0, S1x, S1y, S2x, S2y] via one MXU matmul; accumulated over the HW grid axis."""
    @pl.when(pl.program_id(1) == 0)
    def _():
        out_ref[...] = jnp.zeros_like(out_ref)
    out_ref[...] += jnp.dot(x_ref[...].astype(jnp.float32), p_ref[...],
                            preferred_element_type=jnp.float32)


def _moments_vpu_kernel(x_ref, pos_ref, out_ref):
    """Same raw moments on VPU/XLU (v5e path: f32 MXU multi-pass would be the bottleneck there)."""
    @pl.when(pl.program_id(1) == 0)
    def _():
        out_ref[...] = jnp.zeros_like(out_ref)
    x = x_ref[...].astype(jnp.float32)
    px, py = pos_ref[0:1, :], pos_ref[1:2, :]
    px2, py2 = pos_ref[2:3, :], pos_ref[3:4, :]
    # Five tiny single-lane accumulates: negligible next to the streamed x on the
    # HBM-bound v5e path (the merged lane-dense store lives in the MXU path above).
    out_ref[:, 0:1] += jnp.sum(x, axis=1, keepdims=True)
    out_ref[:, 1:2] += jnp.sum(x * px, axis=1, keepdims=True)
    out_ref[:, 2:3] += jnp.sum(x * py, axis=1, keepdims=True)
    out_ref[:, 3:4] += jnp.sum(x * px2, axis=1, keepdims=True)
    out_ref[:, 4:5] += jnp.sum(x * py2, axis=1, keepdims=True)


# ----------------------------- wrapper -----------------------------

def _tpu_generation() -> int:
    try:
        kind = jax.devices()[0].device_kind.lower()
    except Exception:
        return 6
    for g in (7, 6, 5, 4, 3, 2):
        if f"v{g}" in kind:
            return g
    return 6


def center_of_mass_and_std(x, half_size=1.0, eps=1e-4, use_mxu=None):
    """x: (B, H, W). Returns (mean, std), each (B, 2) float32 — CenterOfMassAndStd.forward."""
    b, h, w = x.shape
    hw = h * w
    itemsize = np.dtype(x.dtype).itemsize
    sub = {4: 8, 2: 16, 1: 32}.get(itemsize, 8)          # dtype-aware min sublane multiple

    gen = _tpu_generation()
    if use_mxu is None:
        use_mxu = gen >= 6          # v6e/v7x: fold the reduction into the MXU; v5e & older: VPU/XLU
    if gen in (5, 6):               # 128 MiB physical VMEM
        vmem_limit = 64 * 1024 * 1024
        pool, x_cap = 40 * 1024 * 1024, 16 * 1024 * 1024
    else:                           # v7x (64 MiB physical) / unknown: stay within 32 MiB scoped default
        vmem_limit = 32 * 1024 * 1024
        pool, x_cap = 24 * 1024 * 1024, 12 * 1024 * 1024

    # --- HW (lane) tiling: keep lane-dense; chunk only when `sub` rows would not fit the budget.
    prelim = pool // 4
    if hw * itemsize * sub > prelim:
        hw_tile = max(128, ((prelim // (sub * itemsize)) // 128) * 128)
    else:
        hw_tile = hw

    # --- batch (sublane) tiling, leaving room for the (double-buffered) position constant.
    p_bytes = 2 * hw_tile * (128 if use_mxu else 8) * 4
    x_budget = min(x_cap, max(1 << 20, (pool - p_bytes) // 2))
    rows_budget = max(sub, ((x_budget // max(1, hw_tile * itemsize)) // sub) * sub)
    bp0 = _round_up(b, sub)
    b_tile = min(rows_budget, bp0)
    desired_steps = 4 if gen >= 7 else 2                  # pipelining + megacore sharding
    if bp0 >= desired_steps * sub:
        b_tile = min(b_tile, max(sub, ((bp0 // desired_steps) // sub) * sub))
    bp = _round_up(b, b_tile)

    # If the whole problem is still one grid step, split HW (the reduction axis) so the
    # input DMA overlaps with compute instead of being fully exposed.
    if bp // b_tile == 1 and hw_tile == hw and hw % 256 == 0 and hw >= 2048:
        hw_tile = hw // 2
    hwp = _round_up(hw, hw_tile)

    xf = x.reshape(b, hw)                                  # contiguous dims collapse: free reshape
    if bp != b or hwp != hw:
        xf = jnp.pad(xf, ((0, bp - b), (0, hwp - hw)))     # zero rows/cols add nothing to the moments

    if use_mxu:
        kernel = _moments_mxu_kernel
        p_const = _pos_matrix(h, w, hwp)
        p_spec = pl.BlockSpec((hw_tile, 128), lambda i, k: (k, 0))
    else:
        kernel = _moments_vpu_kernel
        p_const = _pos_rows(h, w, hwp)
        p_spec = pl.BlockSpec((8, hw_tile), lambda i, k: (0, k))

    moments = pl.pallas_call(
        kernel,
        out_shape=jax.ShapeDtypeStruct((bp, 128), jnp.float32),
        grid=(bp // b_tile, hwp // hw_tile),               # reduction (HW) axis last
        in_specs=[
            pl.BlockSpec((b_tile, hw_tile), lambda i, k: (i, k)),  # featuremap rows, lane-dense
            p_spec,                                                 # position-moment constant
        ],
        out_specs=pl.BlockSpec((b_tile, 128), lambda i, k: (i, 0)),  # resident accumulator over k
        compiler_params=pltpu.CompilerParams(
            dimension_semantics=("parallel", "arbitrary"),
            vmem_limit_bytes=vmem_limit),
    )(xf, p_const)

    # Tiny (B, 5) epilogue in plain JAX: derive mean/std from the raw moments.
    # half_size (the learnable nn.Parameter) stays a plain differentiable scalar here.
    m = moments[:b].astype(jnp.float32)
    s0 = m[:, 0:1]                     # sum(x)
    s1 = m[:, 1:3]                     # [sum(x*px), sum(x*py)]
    s2 = m[:, 3:5]                     # [sum(x*px^2), sum(x*py^2)]
    mean = half_size * s1
    var = s2 - 2.0 * mean * s1 + (mean * mean) * s0
    std = jnp.sqrt(jnp.maximum(var, 0.0) + eps)            # clamp guards f32 cancellation when var ~ 0
    return mean, std


# ----------------------------- reference (pure JAX, for verification) -----------------------------

def _center_of_mass_and_std_ref(x, half_size=1.0, eps=1e-4):
    b, h, w = x.shape
    px = jnp.linspace(-1.0, 1.0, w)
    py = jnp.linspace(-1.0, 1.0, h)
    p = jnp.stack([jnp.broadcast_to(px[None, :], (h, w)),
                   jnp.broadcast_to(py[:, None], (h, w))], axis=0)           # (2, H, W)
    mean = half_size * jnp.sum(x[:, None, :, :] * p[None], axis=(2, 3))      # (B, 2)
    diff = p[None] - mean[..., None, None]
    std = jnp.sqrt(jnp.sum(x[:, None, :, :] * (diff * diff), axis=(2, 3)) + eps)
    return mean, std


def _check(x, half_size, eps):
    mref, sref = _center_of_mass_and_std_ref(x, half_size, eps)
    for use_mxu in (None, True, False):      # auto path + both explicit compute paths
        mean, std = center_of_mass_and_std(x, half_size=half_size, eps=eps, use_mxu=use_mxu)
        mean = jax.block_until_ready(mean)
        std = jax.block_until_ready(std)
        assert mean.shape == (x.shape[0], 2) and std.shape == (x.shape[0], 2)
        np.testing.assert_allclose(np.asarray(mean), np.asarray(mref), rtol=1e-4, atol=1e-5)
        np.testing.assert_allclose(np.asarray(std), np.asarray(sref), rtol=1e-4, atol=1e-5)


if __name__ == "__main__":
    key = jax.random.PRNGKey(0)

    def softmax_maps(k, b, h, w):
        logits = jax.random.normal(k, (b, h, w), dtype=jnp.float32)
        # Featuremaps as spatial probability maps (typical input to this head; keeps std real).
        return jax.nn.softmax(logits.reshape(b, -1), axis=-1).reshape(b, h, w)

    k0, k1, k2 = jax.random.split(key, 3)
    _check(softmax_maps(k0, 2, 16, 16), half_size=1.0, eps=1e-4)     # small demo shape
    _check(softmax_maps(k1, 32, 32, 32), half_size=0.75, eps=1e-4)   # multi-step batch grid
    _check(softmax_maps(k2, 2, 64, 64), half_size=1.0, eps=1e-4)     # HW-chunked reduction grid

    print("KERNEL_OK")
</pallas_src>

<mosaic_0001>
module attributes {stable_mosaic.version = 11 : i64} {
  func.func @_moments_mxu_kernel(%arg0: i32, %arg1: i32, %arg2: memref<8x256xf32, #tpu.memory_space<vmem>>, %arg3: memref<256x128xf32, #tpu.memory_space<vmem>>, %arg4: memref<8x128xf32, #tpu.memory_space<vmem>>) attributes {dimension_semantics = [#tpu.dimension_semantics<parallel>, #tpu.dimension_semantics<arbitrary>], iteration_bounds = array<i64: 1, 1>, scalar_prefetch = 0 : i64, scratch_operands = 0 : i64, tpu.core_type = #tpu.core_type<tc>, window_params = [{transform_indices = @transform_0, window_bounds = array<i64: 8, 256>}, {transform_indices = @transform_1, window_bounds = array<i64: 256, 128>}, {transform_indices = @transform_2, window_bounds = array<i64: 8, 128>}]} {
    %c0_i32 = arith.constant 0 : i32
    %0 = arith.cmpi eq, %arg1, %c0_i32 : i32
    %1 = arith.extui %0 : i1 to i32
    %c0_i32_0 = arith.constant 0 : i32
    %2 = arith.cmpi ne, %1, %c0_i32_0 : i32
    scf.if %2 {
      %cst_8 = arith.constant 0.000000e+00 : f32
      %9 = vector.broadcast %cst_8 : f32 to vector<8x128xf32>
      %c0_9 = arith.constant 0 : index
      %c0_10 = arith.constant 0 : index
      %10 = vector.load %arg4[%c0_9, %c0_10] : memref<8x128xf32, #tpu.memory_space<vmem>>, vector<8x128xf32>
      tpu.vector_store %arg4[%c0_9, %c0_10], %9 {strides = array<i32>} : memref<8x128xf32, #tpu.memory_space<vmem>>, vector<8x128xf32>,
    } else {
    }
    %c0 = arith.constant 0 : index
    %c0_1 = arith.constant 0 : index
    %3 = vector.load %arg4[%c0, %c0_1] : memref<8x128xf32, #tpu.memory_space<vmem>>, vector<8x128xf32>
    %c0_2 = arith.constant 0 : index
    %c0_3 = arith.constant 0 : index
    %4 = vector.load %arg2[%c0_2, %c0_3] : memref<8x256xf32, #tpu.memory_space<vmem>>, vector<8x256xf32>
    %c0_4 = arith.constant 0 : index
    %c0_5 = arith.constant 0 : index
    %5 = vector.load %arg3[%c0_4, %c0_5] : memref<256x128xf32, #tpu.memory_space<vmem>>, vector<256x128xf32>
    %cst = arith.constant dense<0.000000e+00> : vector<8x128xf32>
    %6 = tpu.matmul %4, %5, %cst {dimension_numbers = #tpu.dot_dimension_numbers<[1], [0], [0], [1], [0, 0, 1, 1], [], []>} : vector<8x256xf32>, vector<256x128xf32>, vector<8x128xf32> -> vector<8x128xf32>
    %7 = arith.addf %3, %6 : vector<8x128xf32>
    %c0_6 = arith.constant 0 : index
    %c0_7 = arith.constant 0 : index
    %8 = vector.load %arg4[%c0_6, %c0_7] : memref<8x128xf32, #tpu.memory_space<vmem>>, vector<8x128xf32>
    tpu.vector_store %arg4[%c0_6, %c0_7], %7 {strides = array<i32>} : memref<8x128xf32, #tpu.memory_space<vmem>>, vector<8x128xf32>,
    return
  }
  func.func @transform_0(%arg0: i32, %arg1: i32) -> (i32, i32) {
    %c0_i32 = arith.constant 0 : i32
    return %arg0, %arg1 : i32, i32
  }
  func.func @transform_1(%arg0: i32, %arg1: i32) -> (i32, i32) {
    %c0_i32 = arith.constant 0 : i32
    %c0_i32_0 = arith.constant 0 : i32
    return %arg1, %c0_i32 : i32, i32
  }
  func.func @transform_2(%arg0: i32, %arg1: i32) -> (i32, i32) {
    %c0_i32 = arith.constant 0 : i32
    %c0_i32_0 = arith.constant 0 : i32
    return %arg0, %c0_i32 : i32, i32
  }
}

</mosaic_0001>

<bundles_post_ra>
// kernel: tpu_custom_call.1
= control target key start
LH: loop header
LB: loop body
LE: loop exit
PB: predicated region body
PF: predicated region fallthrough
CT: control target
= control target key end

     0   :  { %7 = vsyncpa [#allocation3], 0  ;;  %s302_s0 = inlined_call_operand.hbm [shape: f32[8,256], index: 0, kind: input, shape index: {}]   ;;  %s303_s1 = inlined_call_operand.hbm [shape: f32[256,128], index: 1, kind: input, shape index: {}]   ;;  %s304_s2 = inlined_call_operand.hbm [shape: f32[8,128], index: 2, kind: output, shape index: {}]  }
   0x1   :  { %8 = vsyncpa [#allocation6], 0 }
   0x2   :  { %9 = vsyncpa [#allocation4], 0  ;;  %s273_s9 = smov [#allocation2]   ;;  %s274_s11 = smov [#allocation5]  }
   0x3   :  { %s16_s10 = sshll.u32 %s273_s9, 4  ;;  %s25_s12 = sshll.u32 %s274_s11, 4  ;;  %s17_s10 = int_to_ptr.vmem [resolvable:$true] %s16_s10  ;;  %s26_s12 = int_to_ptr.vmem [resolvable:$true] %s25_s12 }
   0x4   :  { %s215_s13 = scalar_lea.vmem %s17_s10, 256  ;;  %p220_p1 = scmp.lt.s32.totalorder %s17_s10, %s17_s10 }
   0x5   :  { %p216_p0 = scmp.ne.s32.totalorder %s17_s10, %s215_s13  ;;  %p221_p2 = scmp.lt.s32.totalorder %s215_s13, %s215_s13 }
   0x7   :  { %p222_p3 = por %p221_p2, %p220_p1 }
   0x9   :  { %p223_p4 = pnand %p222_p3, %p216_p0 }
   0xb   :  { %226 = shalt.err (!%p223_p4)
}
   0xc   :  { %19 = dma.hbm_to_vmem [thread:$0]  %s302_s0, 256, %s17_s10, [#allocation3]  }
   0xd   :  { %s235_s16 = scalar_lea.vmem %s26_s12, 4096  ;;  %p240_p6 = scmp.lt.s32.totalorder %s26_s12, %s26_s12 }
   0xe   :  { %p236_p5 = scmp.ne.s32.totalorder %s26_s12, %s235_s16  ;;  %p241_p7 = scmp.lt.s32.totalorder %s235_s16, %s235_s16 }
  0x10   :  { %p242_p8 = por %p241_p7, %p240_p6 }
  0x12   :  { %p243_p9 = pnand %p242_p8, %p236_p5 }
  0x14   :  { %246 = shalt.err (!%p243_p9)
}
  0x15   :  { %s275_s17 = smov 128   ;;  %s276_s18 = smov 8  }
  0x16   :  { %31 = dma.hbm_to_vmem [thread:$0]  %s303_s1, 4096, %s26_s12, [#allocation6], %s275_s17, %s275_s17, %s276_s18  }
  0x17   :  { %267 = dma.done.wait [#allocation3], 256  }
  0x18   :  { %268 = vsyncadd [#allocation3], 4294967040 }
  0x19   :  { %269 = dma.done.wait [#allocation6], 4096  }
  0x1a   :  { %270 = vsyncadd [#allocation6], 4294963200  ;;  %v77_v0 = vld [vmem:[#allocation5 + $0xf8] sm:$0xff]  ;;  %v76_v2 = vld [vmem:[#allocation5 + $0xf0] sm:$0xff]  ;;  %s277_s0 = smov [#allocation7]  }
  0x1b   :  { %v61_v1 = vld [vmem:[#allocation5 + $0x78] sm:$0xff]  ;;  %166 = vmatprep.subr.mxu0 %v77_v0  ;;  %v60_v3 = vld [vmem:[#allocation5 + $0x70] sm:$0xff]  ;;  %v75_v4 = vld [vmem:[#allocation5 + $0xe8] sm:$0xff]  ;;  %s156_s1 = sshll.u32 %s277_s0, 4  ;;  %s157_s1 = int_to_ptr.vmem [resolvable:$true] %s156_s1 }
  0x1c   :  { %167 = vmatpush3.msra.mxu0 %v61_v1  ;;  %v59_v5 = vld [vmem:[#allocation5 + $0x68] sm:$0xff]  ;;  %v74_v6 = vld [vmem:[#allocation5 + $0xe0] sm:$0xff]  ;;  %v73_v8 = vld [vmem:[#allocation5 + $0xd8] sm:$0xff]  ;;  %s247_s21 = scalar_lea.vmem %s157_s1, 128  ;;  %p252_p11 = scmp.lt.s32.totalorder %s157_s1, %s157_s1 }
  0x1d   :  { %168 = vmatprep.subr.mxu0 %v76_v2  ;;  %v58_v7 = vld [vmem:[#allocation5 + $0x60] sm:$0xff]  ;;  %v57_v9 = vld [vmem:[#allocation5 + $0x58] sm:$0xff]  ;;  %v72_v10 = vld [vmem:[#allocation5 + $0xd0] sm:$0xff]  ;;  %p248_p10 = scmp.ne.s32.totalorder %s157_s1, %s247_s21  ;;  %p253_p12 = scmp.lt.s32.totalorder %s247_s21, %s247_s21 }
  0x1e   :  { %169 = vmatpush3.msra.mxu0 %v60_v3  ;;  %v56_v11 = vld [vmem:[#allocation5 + $0x50] sm:$0xff]  ;;  %v71_v12 = vld [vmem:[#allocation5 + $0xc8] sm:$0xff]  ;;  %v45_v13 = vld [vmem:[#allocation2 + $0x8] sm:$0xff] }
  0x1f   :  { %170 = vmatprep.subr.mxu0 %v75_v4  ;;  %v55_v14 = vld [vmem:[#allocation5 + $0x48] sm:$0xff]  ;;  %142 = vmatprep.mubr.f32.mxu0 %v45_v13  ;;  %v70_v15 = vld [vmem:[#allocation5 + $0xc0] sm:$0xff]  ;;  %v69_v17 = vld [vmem:[#allocation5 + $0xb8] sm:$0xff]  ;;  %p254_p13 = por %p253_p12, %p252_p11 }
  0x20   :  { %171 = vmatpush3.msra.mxu0 %v59_v5  ;;  %v54_v16 = vld [vmem:[#allocation5 + $0x40] sm:$0xff]  ;;  %v53_v18 = vld [vmem:[#allocation5 + $0x38] sm:$0xff]  ;;  %v68_v19 = vld [vmem:[#allocation5 + $0xb0] sm:$0xff] }
  0x21   :  { %172 = vmatprep.subr.mxu0 %v74_v6  ;;  %v52_v20 = vld [vmem:[#allocation5 + $0x30] sm:$0xff]  ;;  %v67_v21 = vld [vmem:[#allocation5 + $0xa8] sm:$0xff]  ;;  %v66_v23 = vld [vmem:[#allocation5 + $0xa0] sm:$0xff]  ;;  %p255_p0 = pnand %p254_p13, %p248_p10 }
  0x22   :  { %173 = vmatpush3.msra.mxu0 %v58_v7  ;;  %v51_v22 = vld [vmem:[#allocation5 + $0x28] sm:$0xff]  ;;  %v50_v24 = vld [vmem:[#allocation5 + $0x20] sm:$0xff]  ;;  %v65_v25 = vld [vmem:[#allocation5 + $0x98] sm:$0xff] }
  0x23   :  { %174 = vmatprep.subr.mxu0 %v73_v8  ;;  %v49_v26 = vld [vmem:[#allocation5 + $0x18] sm:$0xff]  ;;  %v64_v27 = vld [vmem:[#allocation5 + $0x90] sm:$0xff]  ;;  %v63_v29 = vld [vmem:[#allocation5 + $0x88] sm:$0xff] }
  0x24   :  { %175 = vmatpush3.msra.mxu0 %v57_v9  ;;  %v48_v28 = vld [vmem:[#allocation5 + $0x10] sm:$0xff]  ;;  %v47_v30 = vld [vmem:[#allocation5 + $0x8] sm:$0xff]  ;;  %v62_v31 = vld [vmem:[#allocation5 + $0x80] sm:$0xff] }
  0x25   :  { %176 = vmatprep.subr.mxu0 %v72_v10  ;;  %v46_v32 = vld [vmem:[#allocation5] sm:$0xff]  ;;  %v44_v33 = vld [vmem:[#allocation2] sm:$0xff] }
  0x26   :  { %177 = vmatpush3.msra.mxu0 %v56_v11 }
  0x27   :  { %178 = vmatprep.subr.mxu0 %v71_v12 }
  0x28   :  { %179 = vmatpush3.msra.mxu0 %v55_v14 }
  0x29   :  { %180 = vmatprep.subr.mxu0 %v70_v15 }
  0x2a   :  { %181 = vmatpush3.msra.mxu0 %v54_v16 }
  0x2b   :  { %182 = vmatprep.subr.mxu0 %v69_v17 }
  0x2c   :  { %183 = vmatpush3.msra.mxu0 %v53_v18 }
  0x2d   :  { %184 = vmatprep.subr.mxu0 %v68_v19 }
  0x2e   :  { %185 = vmatpush3.msra.mxu0 %v52_v20 }
  0x2f   :  { %186 = vmatprep.subr.mxu0 %v67_v21 }
  0x30   :  { %187 = vmatpush3.msra.mxu0 %v51_v22 }
  0x31   :  { %188 = vmatprep.subr.mxu0 %v66_v23 }
  0x32   :  { %189 = vmatpush3.msra.mxu0 %v50_v24 }
  0x33   :  { %190 = vmatprep.subr.mxu0 %v65_v25 }
  0x34   :  { %191 = vmatpush3.msra.mxu0 %v49_v26 }
  0x35   :  { %192 = vmatprep.subr.mxu0 %v64_v27 }
  0x36   :  { %193 = vmatpush3.msra.mxu0 %v48_v28 }
  0x37   :  { %194 = vmatprep.subr.mxu0 %v63_v29 }
  0x38   :  { %195 = vmatpush3.msra.mxu0 %v47_v30 }
  0x39   :  { %196 = vmatprep.subr.mxu0 %v62_v31 }
  0x3a   :  { %197 = vmatpush3.msra.mxu0 %v46_v32 }
  0x3b   :  { %143 = vmatmul.mubr.f32.vlgmr.msra.gmra.mxu0 %v44_v33 }
  0xfb   :  { %v198_v34 = vpop.f32.mrf.mxu0 }
  0xfd   :  { %v199_v35 = vpop.f32.mrf.mxu0 }
  0xfe   :  { %v200_v36 = vadd.f32 %v199_v35, %v198_v34 }
 0x100   :  { %149 = vst [vmem:[#allocation7] sm:$0xff] %v200_v36 }
 0x101   :  { %258 = shalt.err (!%p255_p0)
}
 0x102   :  { %159 = dma.vmem_to_hbm [thread:$0]  %s157_s1, 128, %s304_s2, [#allocation4]  }
 0x103   :  { %271 = dma.done.wait [#allocation4], 128  }
 0x104   :  { %272 = vsyncadd [#allocation4], 4294967168 }
 0x105   :  { %163 = vsyncpa [#allocation3], 1 }
 0x106   :  { %164 = vsyncpa [#allocation6], 1 }
 0x107   :  { %165 = vsyncpa [#allocation4], 1 }

</bundles_post_ra>
